<compile_context>
chip_gen: v7x
topology: tpu7x:2x2x1
jax: 0.10.0
libtpu: 0.0.40
codegen_flags: <defaults>
</compile_context>

<pallas_src>
import functools
import math

import jax
import jax.numpy as jnp
from jax import lax
from jax.experimental import pallas as pl
from jax.experimental.pallas import tpu as pltpu

_HIGHEST = lax.Precision.HIGHEST


# ----------------------------------------------------------------------------
# Small helpers
# ----------------------------------------------------------------------------
def _cdiv(a, b):
    return (a + b - 1) // b


def _round_up(a, m):
    return ((a + m - 1) // m) * m


def _vmem_limit_bytes():
    """Scoped-VMEM limit adapted to the chip: 64 MiB on v5e/v6e (128 MiB
    physical), 32 MiB on v7x (64 MiB per TC) or when the query fails."""
    try:
        cap = int(pltpu.get_tpu_info().vmem_capacity_bytes)
    except Exception:
        cap = 64 * 1024 * 1024
    if cap >= 96 * 1024 * 1024:
        return 64 * 1024 * 1024
    return 32 * 1024 * 1024


# ----------------------------------------------------------------------------
# Hoisted weight preparation (pure function of weight / bias / channels).
# ----------------------------------------------------------------------------
def prepare_dense(weight, bias, channels, *, activation=False, residual=False):
    num_ch, OUT, IN = weight.shape
    C = int(channels.shape[0])
    channels = channels.astype(jnp.int32)
    if residual and OUT not in (IN, 2 * IN):
        raise NotImplementedError("residual requires OUT == IN or OUT == 2*IN")

    # Fused block-diagonal path only when the flat dims stay small and the
    # per-channel matmuls would NOT already fill the MXU on their own.
    fused = (C * IN <= 1024 and C * OUT <= 1024 and C <= 8
             and not (IN >= 128 and OUT >= 128))

    wg = jnp.transpose(jnp.take(weight, channels, axis=0), (0, 2, 1))  # (C,IN,OUT)
    bg = None if bias is None else jnp.take(bias, channels, axis=0)    # (C,OUT)

    prep = dict(mode="fused" if fused else "grouped",
                activation=bool(activation), residual=bool(residual),
                C=C, IN=IN, OUT=OUT, r=None)
    if fused:
        eye = jnp.eye(C, dtype=weight.dtype)
        prep["w"] = jnp.einsum("cio,cd->cido", wg, eye).reshape(C * IN, C * OUT)
        prep["b"] = None if bg is None else bg.reshape(1, C * OUT)
        if residual and OUT == 2 * IN:
            # Block-diagonal [I | I]: x @ r_bd == flatten(cat([x, x], -1)).
            r_blk = jnp.concatenate(
                [jnp.eye(IN, dtype=weight.dtype)] * 2, axis=1)     # (IN, OUT)
            prep["r"] = jnp.einsum("io,cd->cido", r_blk, eye).reshape(
                C * IN, C * OUT)
    else:
        prep["w"] = wg
        prep["b"] = None if bg is None else bg.reshape(C, 1, OUT)
    return prep


# ----------------------------------------------------------------------------
# Fused (block-diagonal) path: one wide lane-dense matmul per N tile.
# ----------------------------------------------------------------------------
def _fused_kernel(x_ref, w_ref, *rest, activation, add_x, has_bias, has_r):
    refs = list(rest)
    o_ref = refs.pop()
    b_ref = refs.pop(0) if has_bias else None
    r_ref = refs.pop(0) if has_r else None

    x = x_ref[...]                                                 # (TN, C*IN)
    out = jnp.dot(x, w_ref[...], preferred_element_type=jnp.float32,
                  precision=_HIGHEST)
    if has_bias:
        out = out + b_ref[...]                                     # (1, C*OUT)
    if activation:
        out = jnp.tanh(out)
    if add_x:
        # Only valid because OUT == IN so the flat (TN, C*IN)/(TN, C*OUT)
        # layouts align channel-block by channel-block (asserted in wrapper).
        out = out + x
    if has_r:
        # residual with OUT == 2*IN: block-diag [I|I] expansion on the MXU
        # keeps the store full-width / lane-dense (no sub-128 slice stores).
        out = out + jnp.dot(x, r_ref[...], preferred_element_type=jnp.float32,
                            precision=_HIGHEST)
    o_ref[...] = out.astype(o_ref.dtype)


def _dense_fused(prep, x):
    N, C, IN = x.shape
    OUT = prep["OUT"]
    CIN, COUT = C * IN, C * OUT
    w_bd, b_bd, r_bd = prep["w"], prep["b"], prep["r"]
    has_bias, has_r = b_bd is not None, r_bd is not None
    add_x = prep["residual"] and not has_r
    if add_x:
        assert OUT == IN, "flat residual add requires OUT == IN"

    x_flat = x.reshape(N, CIN)                     # contiguous -> free reshape

    vmem_limit = _vmem_limit_bytes()
    budget = (vmem_limit * 3) // 4
    # Conservative: assume weight-like operands double-buffered (fallback case).
    resident = 2 * 4 * CIN * COUT * (2 if has_r else 1) + 2 * 4 * COUT
    avail = budget - resident
    tn_cap = 8
    if avail > 0:
        tn_cap = max(8, (avail // (2 * 4 * (CIN + COUT))) // 8 * 8)
    tn_cap = min(tn_cap, 2048)
    if N <= 8:
        tn = N
    else:
        # >=2 grid steps so both v7x TensorCores get work; capped by VMEM budget.
        tn = min(tn_cap, _round_up(_cdiv(N, 2), 8))
    grid = (_cdiv(N, tn),)

    kernel = functools.partial(_fused_kernel, activation=prep["activation"],
                               add_x=add_x, has_bias=has_bias, has_r=has_r)

    def _call(single_buffer_weights):
        if single_buffer_weights:
            const_kw = dict(pipeline_mode=pl.Buffered(1))   # constant block index
        else:
            const_kw = {}
        in_specs = [pl.BlockSpec((tn, CIN), lambda i: (i, 0)),
                    pl.BlockSpec((CIN, COUT), lambda i: (0, 0), **const_kw)]
        args = [x_flat, w_bd]
        if has_bias:
            in_specs.append(pl.BlockSpec((1, COUT), lambda i: (0, 0), **const_kw))
            args.append(b_bd)
        if has_r:
            in_specs.append(pl.BlockSpec((CIN, COUT), lambda i: (0, 0), **const_kw))
            args.append(r_bd)
        return pl.pallas_call(
            kernel,
            out_shape=jax.ShapeDtypeStruct((N, COUT), x.dtype),
            grid=grid,
            in_specs=in_specs,
            out_specs=pl.BlockSpec((tn, COUT), lambda i: (i, 0)),
            compiler_params=pltpu.CompilerParams(
                dimension_semantics=("parallel",),
                vmem_limit_bytes=vmem_limit),
        )(*args)

    try:
        out_flat = _call(True)
    except Exception:
        out_flat = _call(False)     # fallback: default double buffering
    return out_flat.reshape(N, C, OUT)


# ----------------------------------------------------------------------------
# Grouped fallback: channel-major, G channels per grid step, tiled over N.
# ----------------------------------------------------------------------------
def _grouped_kernel(x_ref, w_ref, *rest, activation, residual, has_bias,
                    in_f, out_f):
    refs = list(rest)
    o_ref = refs.pop()
    x = x_ref[...]                                                 # (G, TN, IN)
    out = jnp.einsum("gni,gio->gno", x, w_ref[...],
                     preferred_element_type=jnp.float32,
                     precision=_HIGHEST)                           # (G, TN, OUT)
    if has_bias:
        out = out + refs[0][...]                                   # (G, 1, OUT)
    if activation:
        out = jnp.tanh(out)
    if residual and out_f == in_f:
        o_ref[...] = (out + x).astype(o_ref.dtype)
    elif residual:                                                 # out_f == 2*in_f
        o_ref[:, :, :in_f] = (out[:, :, :in_f] + x).astype(o_ref.dtype)
        o_ref[:, :, in_f:] = (out[:, :, in_f:] + x).astype(o_ref.dtype)
    else:
        o_ref[...] = out.astype(o_ref.dtype)


def _dense_grouped(prep, x):
    N, C, IN = x.shape
    OUT = prep["OUT"]
    wg, bg = prep["w"], prep["b"]
    has_bias = bg is not None

    # TODO(synk): keep activations channel-major across consecutive Dense
    # layers (or store directly to (N, C, OUT) blocks) so these two full
    # HBM-round-trip transposes happen once per stack instead of per layer.
    x_cm = jnp.transpose(x, (1, 0, 2))                              # (C, N, IN)

    vmem_limit = _vmem_limit_bytes()
    budget = (vmem_limit * 3) // 4
    G, tn_cap = 1, 8
    for g in range(min(C, 8), 0, -1):
        if C % g:
            continue
        # Double-buffered weight/bias AND x/out blocks (accounting fixed).
        resident = g * 2 * 4 * (IN * OUT + OUT)
        avail = budget - resident
        if avail <= 0:
            continue
        cap = avail // (g * 2 * 4 * (IN + OUT))
        cap = min((cap // 8) * 8, 1024)
        if cap >= 8:
            G, tn_cap = g, cap
            break
    if N <= 8:
        tn = N
    else:
        tn = min(tn_cap, _round_up(_cdiv(N, 2), 8))

    grid = (C // G, _cdiv(N, tn))   # channel groups outer, N tiles inner
                                    # -> weight block reused across N tiles

    in_specs = [
        pl.BlockSpec((G, tn, IN), lambda cg, nt: (cg, nt, 0)),
        pl.BlockSpec((G, IN, OUT), lambda cg, nt: (cg, 0, 0)),
    ]
    args = [x_cm, wg]
    if has_bias:
        in_specs.append(pl.BlockSpec((G, 1, OUT), lambda cg, nt: (cg, 0, 0)))
        args.append(bg)

    kernel = functools.partial(_grouped_kernel, activation=prep["activation"],
                               residual=prep["residual"], has_bias=has_bias,
                               in_f=IN, out_f=OUT)

    out_cm = pl.pallas_call(
        kernel,
        out_shape=jax.ShapeDtypeStruct((C, N, OUT), x.dtype),
        grid=grid,
        in_specs=in_specs,
        out_specs=pl.BlockSpec((G, tn, OUT), lambda cg, nt: (cg, nt, 0)),
        compiler_params=pltpu.CompilerParams(
            dimension_semantics=("parallel", "parallel"),
            vmem_limit_bytes=vmem_limit),
    )(*args)
    return jnp.transpose(out_cm, (1, 0, 2))                         # (N, C, OUT)


# ----------------------------------------------------------------------------
# Public entry points
# ----------------------------------------------------------------------------
def dense_apply(prep, x, channels):
    """Forward pass using prepared (hoisted) parameters."""
    N, C, IN = x.shape
    assert C == prep["C"] and IN == prep["IN"]
    if prep["mode"] == "fused":
        out = _dense_fused(prep, x)
    else:
        out = _dense_grouped(prep, x)
    return out, channels


def dense_forward(x, channels, weight, bias=None, *,
                  activation=False, residual=False):
    """Convenience one-shot forward (prep is re-done; prefer prepare+apply)."""
    prep = prepare_dense(weight, bias, channels,
                         activation=activation, residual=residual)
    return dense_apply(prep, x, channels)


# ----------------------------------------------------------------------------
# Pure-JAX reference + demo
# ----------------------------------------------------------------------------
def _reference(x, channels, weight, bias, activation, residual):
    w = weight[channels]                                   # (C, OUT, IN)
    out = jnp.einsum("nci,coi->nco", x, w, precision=_HIGHEST)
    if bias is not None:
        out = out + bias[channels][None, :, :]
    if activation:
        out = jnp.tanh(out)
    if residual:
        if out.shape[2] == x.shape[2]:
            out = out + x
        else:
            out = out + jnp.concatenate([x, x], axis=2)
    return out


def _make_params(key, num_channels, in_features, out_features, use_bias):
    k_w, k_b = jax.random.split(key)
    bound = 1.0 / math.sqrt(in_features)   # kaiming_uniform(a=sqrt(5)) bound
    weight = jax.random.uniform(
        k_w, (num_channels, out_features, in_features),
        minval=-bound, maxval=bound, dtype=jnp.float32)
    bias = jax.random.uniform(
        k_b, (num_channels, out_features),
        minval=-bound, maxval=bound, dtype=jnp.float32) if use_bias else None
    return weight, bias


def _run_case(key, *, num_channels, in_features, out_features, N, C,
              use_bias, activation, residual):
    k_x, k_p, k_c = jax.random.split(key, 3)
    x = jax.random.normal(k_x, (N, C, in_features), dtype=jnp.float32)
    channels = jax.random.randint(k_c, (C,), 0, num_channels, dtype=jnp.int32)
    weight, bias = _make_params(k_p, num_channels, in_features, out_features,
                                use_bias)
    # Prepare once (hoisted, pure function of weight/bias/channels), apply.
    prep = prepare_dense(weight, bias, channels,
                         activation=activation, residual=residual)
    out, _ = dense_apply(prep, x, channels)
    out = jax.block_until_ready(out)
    ref = _reference(x, channels, weight, bias, activation, residual)
    assert out.shape == (N, C, out_features)
    assert jnp.allclose(out, ref, atol=1e-5, rtol=1e-5), "mismatch vs reference"


if __name__ == "__main__":
    key = jax.random.PRNGKey(0)
    ks = jax.random.split(key, 5)

    # 1) Demo config (fused block-diagonal path): 32->32, tanh + residual.
    _run_case(ks[0], num_channels=6, in_features=32, out_features=32,
              N=8, C=4, use_bias=True, activation=True, residual=True)

    # 2) Fused path without bias / activation / residual.
    _run_case(ks[1], num_channels=6, in_features=32, out_features=32,
              N=8, C=4, use_bias=False, activation=False, residual=False)

    # 3) Fused path with doubled residual (OUT == 2*IN), lane-dense store.
    _run_case(ks[2], num_channels=6, in_features=32, out_features=64,
              N=16, C=4, use_bias=True, activation=True, residual=True)

    # 4) Grouped fallback (IN, OUT >= 128): same-size residual.
    _run_case(ks[3], num_channels=3, in_features=128, out_features=128,
              N=32, C=2, use_bias=True, activation=True, residual=True)

    # 5) Grouped fallback with doubled residual (OUT == 2*IN).
    _run_case(ks[4], num_channels=3, in_features=128, out_features=256,
              N=16, C=2, use_bias=True, activation=False, residual=True)

    print("KERNEL_OK")
</pallas_src>

<mosaic_0001>
module attributes {stable_mosaic.version = 11 : i64} {
  func.func @_fused_kernel(%arg0: i32, %arg1: memref<8x128xf32, #tpu.memory_space<vmem>>, %arg2: memref<128x128xf32, #tpu.memory_space<vmem>>, %arg3: memref<1x128xf32, #tpu.memory_space<vmem>>, %arg4: memref<8x128xf32, #tpu.memory_space<vmem>>) attributes {dimension_semantics = [#tpu.dimension_semantics<parallel>], iteration_bounds = array<i64: 1>, scalar_prefetch = 0 : i64, scratch_operands = 0 : i64, tpu.core_type = #tpu.core_type<tc>, window_params = [{transform_indices = @transform_0, window_bounds = array<i64: 8, 128>}, {pipeline_mode = #tpu.pipeline_mode<synchronous>, transform_indices = @transform_1, window_bounds = array<i64: 128, 128>}, {pipeline_mode = #tpu.pipeline_mode<synchronous>, transform_indices = @transform_2, window_bounds = array<i64: 1, 128>}, {transform_indices = @transform_3, window_bounds = array<i64: 8, 128>}]} {
    %c0 = arith.constant 0 : index
    %c0_0 = arith.constant 0 : index
    %0 = vector.load %arg1[%c0, %c0_0] : memref<8x128xf32, #tpu.memory_space<vmem>>, vector<8x128xf32>
    %c0_1 = arith.constant 0 : index
    %c0_2 = arith.constant 0 : index
    %1 = vector.load %arg2[%c0_1, %c0_2] : memref<128x128xf32, #tpu.memory_space<vmem>>, vector<128x128xf32>
    %cst = arith.constant dense<0.000000e+00> : vector<8x128xf32>
    %2 = tpu.matmul %0, %1, %cst {dimension_numbers = #tpu.dot_dimension_numbers<[1], [0], [0], [1], [0, 0, 1, 1], [], []>, precision = #tpu.contract_precision<fp32>} : vector<8x128xf32>, vector<128x128xf32>, vector<8x128xf32> -> vector<8x128xf32>
    %c0_3 = arith.constant 0 : index
    %c0_4 = arith.constant 0 : index
    %3 = vector.load %arg3[%c0_3, %c0_4] : memref<1x128xf32, #tpu.memory_space<vmem>>, vector<1x128xf32>
    %4 = vector.broadcast %3 : vector<1x128xf32> to vector<8x128xf32>
    %5 = arith.addf %2, %4 : vector<8x128xf32>
    %6 = math.tanh %5 : vector<8x128xf32>
    %7 = arith.addf %6, %0 : vector<8x128xf32>
    %c0_5 = arith.constant 0 : index
    %c0_6 = arith.constant 0 : index
    %8 = vector.load %arg4[%c0_5, %c0_6] : memref<8x128xf32, #tpu.memory_space<vmem>>, vector<8x128xf32>
    tpu.vector_store %arg4[%c0_5, %c0_6], %7 {strides = array<i32>} : memref<8x128xf32, #tpu.memory_space<vmem>>, vector<8x128xf32>,
    return
  }
  func.func @transform_0(%arg0: i32) -> (i32, i32) {
    %c0_i32 = arith.constant 0 : i32
    %c0_i32_0 = arith.constant 0 : i32
    return %arg0, %c0_i32 : i32, i32
  }
  func.func @transform_1(%arg0: i32) -> (i32, i32) {
    %c0_i32 = arith.constant 0 : i32
    %c0_i32_0 = arith.constant 0 : i32
    %c0_i32_1 = arith.constant 0 : i32
    return %c0_i32, %c0_i32_0 : i32, i32
  }
  func.func @transform_2(%arg0: i32) -> (i32, i32) {
    %c0_i32 = arith.constant 0 : i32
    %c0_i32_0 = arith.constant 0 : i32
    %c0_i32_1 = arith.constant 0 : i32
    return %c0_i32, %c0_i32_0 : i32, i32
  }
  func.func @transform_3(%arg0: i32) -> (i32, i32) {
    %c0_i32 = arith.constant 0 : i32
    %c0_i32_0 = arith.constant 0 : i32
    return %arg0, %c0_i32 : i32, i32
  }
}

module attributes {stable_mosaic.version = 11 : i64} {
  func.func @_fused_kernel(%arg0: i32, %arg1: memref<8x128xf32, #tpu.memory_space<vmem>>, %arg2: memref<128x128xf32, #tpu.memory_space<vmem>>, %arg3: memref<1x128xf32, #tpu.memory_space<vmem>>, %arg4: memref<8x128xf32, #tpu.memory_space<vmem>>) attributes {dimension_semantics = [#tpu.dimension_semantics<parallel>], iteration_bounds = array<i64: 1>, scalar_prefetch = 0 : i64, scratch_operands = 0 : i64, tpu.core_type = #tpu.core_type<tc>, window_params = [{transform_indices = @transform_0, window_bounds = array<i64: 8, 128>}, {pipeline_mode = #tpu.pipeline_mode<synchronous>, transform_indices = @transform_1, window_bounds = array<i64: 128, 128>}, {pipeline_mode = #tpu.pipeline_mode<synchronous>, transform_indices = @transform_2, window_bounds = array<i64: 1, 128>}, {transform_indices = @transform_3, window_bounds = array<i64: 8, 128>}]} {
    %c0 = arith.constant 0 : index
    %c0_0 = arith.constant 0 : index
    %0 = vector.load %arg1[%c0, %c0_0] : memref<8x128xf32, #tpu.memory_space<vmem>>, vector<8x128xf32>
    %c0_1 = arith.constant 0 : index
    %c0_2 = arith.constant 0 : index
    %1 = vector.load %arg2[%c0_1, %c0_2] : memref<128x128xf32, #tpu.memory_space<vmem>>, vector<128x128xf32>
    %cst = arith.constant dense<0.000000e+00> : vector<8x128xf32>
    %2 = tpu.matmul %0, %1, %cst {dimension_numbers = #tpu.dot_dimension_numbers<[1], [0], [0], [1], [0, 0, 1, 1], [], []>, precision = #tpu.contract_precision<fp32>} : vector<8x128xf32>, vector<128x128xf32>, vector<8x128xf32> -> vector<8x128xf32>
    %c0_3 = arith.constant 0 : index
    %c0_4 = arith.constant 0 : index
    %3 = vector.load %arg3[%c0_3, %c0_4] : memref<1x128xf32, #tpu.memory_space<vmem>>, vector<1x128xf32>
    %4 = vector.broadcast %3 : vector<1x128xf32> to vector<8x128xf32>
    %5 = arith.addf %2, %4 : vector<8x128xf32>
    %6 = math.tanh %5 : vector<8x128xf32>
    %7 = arith.addf %6, %0 : vector<8x128xf32>
    %c0_5 = arith.constant 0 : index
    %c0_6 = arith.constant 0 : index
    %8 = vector.load %arg4[%c0_5, %c0_6] : memref<8x128xf32, #tpu.memory_space<vmem>>, vector<8x128xf32>
    tpu.vector_store %arg4[%c0_5, %c0_6], %7 {strides = array<i32>} : memref<8x128xf32, #tpu.memory_space<vmem>>, vector<8x128xf32>,
    return
  }
  func.func @transform_0(%arg0: i32) -> (i32, i32) {
    %c0_i32 = arith.constant 0 : i32
    %c0_i32_0 = arith.constant 0 : i32
    return %arg0, %c0_i32 : i32, i32
  }
  func.func @transform_1(%arg0: i32) -> (i32, i32) {
    %c0_i32 = arith.constant 0 : i32
    %c0_i32_0 = arith.constant 0 : i32
    %c0_i32_1 = arith.constant 0 : i32
    return %c0_i32, %c0_i32_0 : i32, i32
  }
  func.func @transform_2(%arg0: i32) -> (i32, i32) {
    %c0_i32 = arith.constant 0 : i32
    %c0_i32_0 = arith.constant 0 : i32
    %c0_i32_1 = arith.constant 0 : i32
    return %c0_i32, %c0_i32_0 : i32, i32
  }
  func.func @transform_3(%arg0: i32) -> (i32, i32) {
    %c0_i32 = arith.constant 0 : i32
    %c0_i32_0 = arith.constant 0 : i32
    return %arg0, %c0_i32 : i32, i32
  }
}

</mosaic_0001>

<bundles_post_ra>
// kernel: tpu_custom_call.1
= control target key start
LH: loop header
LB: loop body
LE: loop exit
PB: predicated region body
PF: predicated region fallthrough
CT: control target
= control target key end

     0   :  { %8 = vsyncpa [#allocation3], 0  ;;  %s1600_s0 = inlined_call_operand.hbm [shape: f32[8,128], index: 0, kind: input, shape index: {}]   ;;  %s1601_s1 = inlined_call_operand.hbm [shape: f32[128,128], index: 1, kind: input, shape index: {}]   ;;  %s1602_s2 = inlined_call_operand.vmem [shape: f32[1,128], index: 2, kind: input, shape index: {}]   ;;  %s1603_s3 = inlined_call_operand.hbm [shape: f32[8,128], index: 3, kind: output, shape index: {}]  }
   0x1   :  { %9 = vsyncpa [#allocation6], 0 }
   0x2   :  { %10 = vsyncpa [#allocation4], 0  ;;  %s1274_s12 = smov [#allocation2]   ;;  %s1275_s14 = smov [#allocation5]  }
   0x3   :  { %s17_s13 = sshll.u32 %s1274_s12, 4  ;;  %s26_s15 = sshll.u32 %s1275_s14, 4  ;;  %s18_s13 = int_to_ptr.vmem [resolvable:$true] %s17_s13  ;;  %s1302_s15 = int_to_ptr.vmem [resolvable:$true] %s26_s15 }
   0x4   :  { %s1202_s18 = scalar_lea.hbm %s1600_s0, 128 }
   0x5   :  { %p1203_p0 = scmp.ne.s32.totalorder %s1600_s0, %s1202_s18  ;;  %p1206_p1 = scmp.lt.u32.totalorder %s1202_s18, %s1600_s0 }
   0x7   :  { %p1208_p2 = pnand %p1206_p1, %p1203_p0 }
   0x9   :  { %1211 = shalt.err (!%p1208_p2)
}
   0xa   :  { %s1212_s23 = scalar_lea.vmem %s18_s13, 128  ;;  %p1217_p4 = scmp.lt.s32.totalorder %s18_s13, %s18_s13 }
   0xb   :  { %p1213_p3 = scmp.ne.s32.totalorder %s18_s13, %s1212_s23  ;;  %p1218_p5 = scmp.lt.s32.totalorder %s1212_s23, %s1212_s23 }
   0xd   :  { %p1219_p6 = por %p1218_p5, %p1217_p4 }
   0xf   :  { %p1220_p7 = pnand %p1219_p6, %p1213_p3 }
  0x11   :  { %1223 = shalt.err (!%p1220_p7)
}
  0x12   :  { %20 = dma.hbm_to_vmem [thread:$0]  %s1600_s0, 128, %s18_s13, [#allocation3]  }
  0x13   :  { %s1224_s28 = scalar_lea.hbm %s1601_s1, 2048 }
  0x14   :  { %p1225_p8 = scmp.ne.s32.totalorder %s1601_s1, %s1224_s28  ;;  %p1228_p9 = scmp.lt.u32.totalorder %s1224_s28, %s1601_s1 }
  0x16   :  { %p1230_p10 = pnand %p1228_p9, %p1225_p8 }
  0x18   :  { %1233 = shalt.err (!%p1230_p10)
}
  0x19   :  { %s1234_s6 = scalar_lea.vmem %s1302_s15, 2048  ;;  %p1239_p12 = scmp.lt.s32.totalorder %s1302_s15, %s1302_s15 }
  0x1a   :  { %p1235_p11 = scmp.ne.s32.totalorder %s1302_s15, %s1234_s6  ;;  %p1240_p13 = scmp.lt.s32.totalorder %s1234_s6, %s1234_s6 }
  0x1c   :  { %p1241_p0 = por %p1240_p13, %p1239_p12 }
  0x1e   :  { %p1242_p1 = pnand %p1241_p0, %p1235_p11 }
  0x20   :  { %1245 = shalt.err (!%p1242_p1)
}
  0x21   :  { %s1276_s0 = smov 128   ;;  %s1277_s7 = smov 8  }
  0x22   :  { %32 = dma.hbm_to_vmem [thread:$0]  %s1601_s1, 2048, %s1302_s15, [#allocation6], %s1276_s0, %s1276_s0, %s1277_s7  }
  0x23   :  { %1268 = dma.done.wait [#allocation3], 128  }
  0x24   :  { %1269 = vsyncadd [#allocation3], 4294967168 }
  0x25   :  { %1270 = dma.done.wait [#allocation6], 2048  }
  0x26   :  { %1271 = vsyncadd [#allocation6], 4294965248  ;;  %v1278_v0 = vmov 0.0|0.0   ;;  %vm1279_vm0 = vmmov 0   ;;  %v1280_v1 = vmov 0.0   ;;  %v42_v2 = vld [vmem:[#allocation5] sm:$0xff] }
  0x27   :  { %1038 = vmatprep.subr.bf16.mxu1 %v1278_v0  ;;  %1110 = vmatprep.subr.bf16.mxu0 %v1278_v0  ;;  %v43_v3 = vld [vmem:[#allocation5 + $0x8] sm:$0xff]  ;;  %v44_v4 = vld [vmem:[#allocation5 + $0x10] sm:$0xff]  ;;  %v66_v5 = vand.u32 4294901760, %v42_v2  ;;  %v45_v7 = vld [vmem:[#allocation5 + $0x18] sm:$0xff]  ;;  %s1281_s11 = smov [#allocation7]  }
  0x28   :  { %860 = vmatprep.mubr.msk.f32.mxu1 %vm1279_vm0, %v1280_v1  ;;  %965 = vmatprep.mubr.msk.f32.mxu0 %vm1279_vm0, %v1280_v1  ;;  %v69_v6 = vand.u32 4294901760, %v43_v3  ;;  %v72_v8 = vand.u32 4294901760, %v44_v4  ;;  %v75_v9 = vand.u32 4294901760, %v45_v7  ;;  %v46_v10 = vld [vmem:[#allocation5 + $0x20] sm:$0xff]  ;;  %v47_v11 = vld [vmem:[#allocation5 + $0x28] sm:$0xff]  ;;  %v48_v16 = vld [vmem:[#allocation5 + $0x30] sm:$0xff] }
  0x29   :  { %v78_v14 = vand.u32 4294901760, %v46_v10  ;;  %v81_v15 = vand.u32 4294901760, %v47_v11  ;;  %v49_v17 = vld [vmem:[#allocation5 + $0x38] sm:$0xff]  ;;  %v84_v19 = vand.u32 4294901760, %v48_v16  ;;  %v1353_v21 = vld [vmem:[#allocation5 + $0x40] sm:$0xff]  ;;  %v1355_v22 = vld [vmem:[#allocation5 + $0x48] sm:$0xff]  ;;  %v1371_v29 = vsub.f32 %v42_v2, %v66_v5 }
  0x2a   :  { %v1339_v12 = vpack.c.bf16 %v69_v6, %v66_v5  ;;  %v1343_v13 = vpack.c.bf16 %v75_v9, %v72_v8  ;;  %v87_v20 = vand.u32 4294901760, %v49_v17  ;;  %v90_v24 = vand.u32 4294901760, %v1353_v21  ;;  %v1363_v26 = vld [vmem:[#allocation2] sm:$0xff]  ;;  %v1367_v27 = vld [vmem:[#allocation5 + $0x50] sm:$0xff]  ;;  %v1384_v35 = vld [vmem:[#allocation5 + $0x60] sm:$0xff]  ;;  %s715_s12 = sshll.u32 %s1281_s11, 4  ;;  %s716_s12 = int_to_ptr.vmem [resolvable:$true] %s715_s12 }
  0x2b   :  { %v1349_v18 = vpack.c.bf16 %v81_v15, %v78_v14  ;;  %v93_v25 = vand.u32 4294901760, %v1355_v22  ;;  %v1369_v28 = vld [vmem:[#allocation5 + $0x58] sm:$0xff]  ;;  %v1374_v30 = vand.u32 4294901760, %v1363_v26  ;;  %v1376_v31 = vsub.f32 %v43_v3, %v69_v6  ;;  %v1388_v36 = vld [vmem:[#allocation5 + $0x68] sm:$0xff]  ;;  %v1408_v43 = vld [vmem:[#allocation5 + $0x70] sm:$0xff]  ;;  %s1246_s13 = scalar_lea.vmem %s716_s12, 128  ;;  %p1251_p3 = scmp.lt.s32.totalorder %s716_s12, %s716_s12 }
  0x2c   :  { %1040 = vmatpush3.bf16.msra.mxu1 %v1339_v12  ;;  %1112 = vmatpush3.bf16.msra.mxu0 %v1339_v12  ;;  %v1359_v23 = vpack.c.bf16 %v87_v20, %v84_v19  ;;  %v96_v33 = vand.u32 4294901760, %v1367_v27  ;;  %v99_v34 = vand.u32 4294901760, %v1369_v28  ;;  %v1390_v37 = vsub.f32 %v44_v4, %v72_v8  ;;  %v1410_v44 = vld [vmem:[#allocation5 + $0x78] sm:$0xff]  ;;  %p1247_p2 = scmp.ne.s32.totalorder %s716_s12, %s1246_s13  ;;  %p1252_p4 = scmp.lt.s32.totalorder %s1246_s13, %s1246_s13 }
  0x2d   :  { %1041 = vmatprep.subr.bf16.mxu1 %v1278_v0  ;;  %1113 = vmatprep.subr.bf16.mxu0 %v1278_v0  ;;  %v1380_v32 = vpack.c.bf16 %v93_v25, %v90_v24  ;;  %v1392_v38 = vsub.f32 %v45_v7, %v75_v9  ;;  %v102_v39 = vand.u32 4294901760, %v1384_v35  ;;  %v1397_v40 = vsub.f32 %v1363_v26, %v1374_v30 }
  0x2e   :  { %v1405_v41 = vpack.c.bf16 %v99_v34, %v96_v33  ;;  %v105_v42 = vand.u32 4294901760, %v1388_v36  ;;  %v159_v45 = vand.u32 4294901760, %v1371_v29  ;;  %v166_v46 = vand.u32 4294901760, %v1376_v31  ;;  %p1253_p5 = por %p1252_p4, %p1251_p3 }
  0x2f   :  { %v1416_v47 = vsub.f32 %v46_v10, %v78_v14  ;;  %v1418_v48 = vsub.f32 %v47_v11, %v81_v15  ;;  %v108_v49 = vand.u32 4294901760, %v1408_v43  ;;  %v111_v50 = vand.u32 4294901760, %v1410_v44 }
  0x30   :  { %1043 = vmatpush3.bf16.msra.mxu1 %v1343_v13  ;;  %1115 = vmatpush3.bf16.msra.mxu0 %v1343_v13  ;;  %v148_v51 = vand.u32 4294901760, %v1397_v40  ;;  %v173_v52 = vand.u32 4294901760, %v1390_v37  ;;  %v1430_v53 = vpack.c.bf16 %v105_v42, %v102_v39  ;;  %v160_v54 = vsub.f32 %v1371_v29, %v159_v45  ;;  %p1254_p6 = pnand %p1253_p5, %p1247_p2 }
  0x31   :  { %1044 = vmatprep.subr.bf16.mxu1 %v1278_v0  ;;  %1116 = vmatprep.subr.bf16.mxu0 %v1278_v0  ;;  %v167_v55 = vsub.f32 %v1376_v31, %v166_v46  ;;  %v180_v56 = vand.u32 4294901760, %v1392_v38  ;;  %v1437_v57 = vsub.f32 %v48_v16, %v84_v19  ;;  %v1439_v58 = vsub.f32 %v49_v17, %v87_v20 }
  0x32   :  { %v149_v59 = vsub.f32 %v1397_v40, %v148_v51  ;;  %v174_v60 = vsub.f32 %v1390_v37, %v173_v52  ;;  %v187_v61 = vand.u32 4294901760, %v1416_v47  ;;  %v194_v62 = vand.u32 4294901760, %v1418_v48 }
  0x33   :  { %v1451_v63 = vpack.c.bf16 %v111_v50, %v108_v49  ;;  %v161_v2 = vand.u32 4294901760, %v160_v54  ;;  %v168_v3 = vand.u32 4294901760, %v167_v55  ;;  %v181_v4 = vsub.f32 %v1392_v38, %v180_v56 }
  0x34   :  { %1046 = vmatpush3.bf16.msra.mxu1 %v1349_v18  ;;  %1118 = vmatpush3.bf16.msra.mxu0 %v1349_v18  ;;  %v1457_v5 = vsub.f32 %v1353_v21, %v90_v24  ;;  %v1460_v6 = vsub.f32 %v1355_v22, %v93_v25  ;;  %v1135_v7 = vpack.c.bf16 %v166_v46, %v159_v45  ;;  %v150_v8 = vand.u32 4294901760, %v149_v59 }
  0x35   :  { %1047 = vmatprep.subr.bf16.mxu1 %v1278_v0  ;;  %1119 = vmatprep.subr.bf16.mxu0 %v1278_v0  ;;  %v175_v9 = vand.u32 4294901760, %v174_v60  ;;  %v188_v10 = vsub.f32 %v1416_v47, %v187_v61  ;;  %v195_v11 = vsub.f32 %v1418_v48, %v194_v62  ;;  %v1063_v14 = vpack.c.bf16 %v168_v3, %v161_v2 }
  0x36   :  { %v182_v15 = vand.u32 4294901760, %v181_v4  ;;  %v201_v16 = vand.u32 4294901760, %v1437_v57  ;;  %v208_v17 = vand.u32 4294901760, %v1439_v58  ;;  %v1473_v19 = vsub.f32 %v1367_v27, %v96_v33 }
  0x37   :  { %v1478_v20 = vsub.f32 %v1369_v28, %v99_v34  ;;  %v1138_v21 = vpack.c.bf16 %v180_v56, %v173_v52  ;;  %v189_v22 = vand.u32 4294901760, %v188_v10  ;;  %v196_v24 = vand.u32 4294901760, %v195_v11 }
  0x38   :  { %1049 = vmatpush3.bf16.msra.mxu1 %v1359_v23  ;;  %1121 = vmatpush3.bf16.msra.mxu0 %v1359_v23  ;;  %v215_v25 = vand.u32 4294901760, %v1457_v5  ;;  %v1066_v45 = vpack.c.bf16 %v182_v15, %v175_v9  ;;  %v202_v46 = vsub.f32 %v1437_v57, %v201_v16  ;;  %v209_v27 = vsub.f32 %v1439_v58, %v208_v17 }
  0x39   :  { %1050 = vmatprep.subr.bf16.mxu1 %v1278_v0  ;;  %1122 = vmatprep.subr.bf16.mxu0 %v1278_v0  ;;  %v222_v33 = vand.u32 4294901760, %v1460_v6  ;;  %v1489_v28 = vsub.f32 %v1384_v35, %v102_v39  ;;  %v1494_v34 = vsub.f32 %v1388_v36, %v105_v42  ;;  %v1141_v52 = vpack.c.bf16 %v194_v62, %v187_v61 }
  0x3a   :  { %v216_v54 = vsub.f32 %v1457_v5, %v215_v25  ;;  %v229_v55 = vand.u32 4294901760, %v1473_v19  ;;  %v203_v35 = vand.u32 4294901760, %v202_v46  ;;  %v210_v39 = vand.u32 4294901760, %v209_v27 }
  0x3b   :  { %v223_v56 = vsub.f32 %v1460_v6, %v222_v33  ;;  %v236_v36 = vand.u32 4294901760, %v1478_v20  ;;  %v1509_v42 = vsub.f32 %v1408_v43, %v108_v49  ;;  %v1514_v59 = vsub.f32 %v1410_v44, %v111_v50 }
  0x3c   :  { %1052 = vmatpush3.bf16.msra.mxu1 %v1380_v32  ;;  %1124 = vmatpush3.bf16.msra.mxu0 %v1380_v32  ;;  %v1144_v60 = vpack.c.bf16 %v208_v17, %v201_v16  ;;  %v217_v61 = vand.u32 4294901760, %v216_v54  ;;  %v230_v62 = vsub.f32 %v1473_v19, %v229_v55  ;;  %v243_v2 = vand.u32 4294901760, %v1489_v28 }
  0x3d   :  { %1053 = vmatprep.subr.bf16.mxu1 %v1278_v0  ;;  %1125 = vmatprep.subr.bf16.mxu0 %v1278_v0  ;;  %v1072_v3 = vpack.c.bf16 %v210_v39, %v203_v35  ;;  %v224_v4 = vand.u32 4294901760, %v223_v56  ;;  %v250_v43 = vand.u32 4294901760, %v1494_v34  ;;  %v1147_v44 = vpack.c.bf16 %v222_v33, %v215_v25 }
  0x3e   :  { %v231_v49 = vand.u32 4294901760, %v230_v62  ;;  %v244_v50 = vsub.f32 %v1489_v28, %v243_v2  ;;  %v1150_v15 = vpack.c.bf16 %v236_v36, %v229_v55  ;;  %v1090_v54 = vpack.c.bf16 %v1392_v38, %v1390_v37 }
  0x3f   :  { %v1075_v9 = vpack.c.bf16 %v224_v4, %v217_v61  ;;  %v251_v11 = vsub.f32 %v1494_v34, %v250_v43 }
  0x40   :  { %1055 = vmatpush3.bf16.msra.mxu1 %v1405_v41  ;;  %1127 = vmatpush3.bf16.msra.mxu0 %v1405_v41  ;;  %v245_v16 = vand.u32 4294901760, %v244_v50 }
  0x41   :  { %1056 = vmatprep.subr.bf16.mxu1 %v1278_v0  ;;  %1128 = vmatprep.subr.bf16.mxu0 %v1278_v0 }
  0x44   :  { %1058 = vmatpush3.bf16.msra.mxu1 %v1430_v53  ;;  %1130 = vmatpush3.bf16.msra.mxu0 %v1430_v53 }
  0x45   :  { %1059 = vmatprep.subr.bf16.mxu1 %v1278_v0  ;;  %1131 = vmatprep.subr.bf16.mxu0 %v1278_v0 }
  0x48   :  { %1061 = vmatpush3.bf16.msra.mxu1 %v1451_v63  ;;  %1133 = vmatpush3.bf16.msra.mxu0 %v1451_v63 }
  0x49   :  { %1062 = vmatprep.subr.bf16.mxu1 %v1278_v0  ;;  %1134 = vmatprep.subr.bf16.mxu0 %v1278_v0 }
  0x4b   :  { %861 = vmatmul.mubr.f32.vlgmr.msra.gmra.mrb[0].mxu1 %v150_v8  ;;  %966 = vmatmul.mubr.f32.vlgmr.msra.gmra.mrb[0].mxu0 %v148_v51  ;;  %v1069_v51 = vpack.c.bf16 %v196_v24, %v189_v22  ;;  %v257_v8 = vand.u32 4294901760, %v1509_v42 }
  0x4c   :  { %1064 = vmatpush3.bf16.msra.mxu1 %v1063_v14  ;;  %1136 = vmatpush3.bf16.msra.mxu0 %v1135_v7  ;;  %v237_v7 = vsub.f32 %v1478_v20, %v236_v36  ;;  %v264_v14 = vand.u32 4294901760, %v1514_v59 }
  0x4d   :  { %1065 = vmatprep.subr.bf16.mxu1 %v1278_v0  ;;  %1137 = vmatprep.subr.bf16.mxu0 %v1278_v0  ;;  %v258_v22 = vsub.f32 %v1509_v42, %v257_v8 }
  0x4e   :  { %895 = vmatprep.mubr.msk.f32.mxu1 %vm1279_vm0, %v1280_v1  ;;  %1000 = vmatprep.mubr.msk.f32.mxu0 %vm1279_vm0, %v1280_v1  ;;  %v238_v10 = vand.u32 4294901760, %v237_v7  ;;  %v265_v24 = vsub.f32 %v1514_v59, %v264_v14 }
  0x4f   :  { %v259_v46 = vand.u32 4294901760, %v258_v22 }
  0x50   :  { %1067 = vmatpush3.bf16.msra.mxu1 %v1066_v45  ;;  %1139 = vmatpush3.bf16.msra.mxu0 %v1138_v21  ;;  %v1078_v17 = vpack.c.bf16 %v238_v10, %v231_v49  ;;  %v252_v21 = vand.u32 4294901760, %v251_v11  ;;  %v1153_v45 = vpack.c.bf16 %v250_v43, %v243_v2  ;;  %v266_v27 = vand.u32 4294901760, %v265_v24 }
  0x51   :  { %1068 = vmatprep.subr.bf16.mxu1 %v1278_v0  ;;  %1140 = vmatprep.subr.bf16.mxu0 %v1278_v0 }
  0x52   :  { %v1081_v25 = vpack.c.bf16 %v252_v21, %v245_v16  ;;  %v1084_v33 = vpack.c.bf16 %v266_v27, %v259_v46 }
  0x54   :  { %1070 = vmatpush3.bf16.msra.mxu1 %v1069_v51  ;;  %1142 = vmatpush3.bf16.msra.mxu0 %v1141_v52  ;;  %v1156_v51 = vpack.c.bf16 %v264_v14, %v257_v8  ;;  %v1087_v52 = vpack.c.bf16 %v1376_v31, %v1371_v29  ;;  %v1093_v29 = vpack.c.bf16 %v1418_v48, %v1416_v47  ;;  %v725_v31 = vld [vmem:[%s1602_s2] ss:$0 sm:$0xff] }
  0x55   :  { %1071 = vmatprep.subr.bf16.mxu1 %v1278_v0  ;;  %1143 = vmatprep.subr.bf16.mxu0 %v1278_v0 }
  0x58   :  { %1073 = vmatpush3.bf16.msra.mxu1 %v1072_v3  ;;  %1145 = vmatpush3.bf16.msra.mxu0 %v1144_v60 }
  0x59   :  { %1074 = vmatprep.subr.bf16.mxu1 %v1278_v0  ;;  %1146 = vmatprep.subr.bf16.mxu0 %v1278_v0 }
  0x5c   :  { %1076 = vmatpush3.bf16.msra.mxu1 %v1075_v9  ;;  %1148 = vmatpush3.bf16.msra.mxu0 %v1147_v44 }
  0x5d   :  { %1077 = vmatprep.subr.bf16.mxu1 %v1278_v0  ;;  %1149 = vmatprep.subr.bf16.mxu0 %v1278_v0 }
  0x60   :  { %1079 = vmatpush3.bf16.msra.mxu1 %v1078_v17  ;;  %1151 = vmatpush3.bf16.msra.mxu0 %v1150_v15 }
  0x61   :  { %1080 = vmatprep.subr.bf16.mxu1 %v1278_v0  ;;  %1152 = vmatprep.subr.bf16.mxu0 %v1278_v0 }
  0x64   :  { %1082 = vmatpush3.bf16.msra.mxu1 %v1081_v25  ;;  %1154 = vmatpush3.bf16.msra.mxu0 %v1153_v45 }
  0x65   :  { %1083 = vmatprep.subr.bf16.mxu1 %v1278_v0  ;;  %1155 = vmatprep.subr.bf16.mxu0 %v1278_v0 }
  0x68   :  { %1085 = vmatpush3.bf16.msra.mxu1 %v1084_v33  ;;  %1157 = vmatpush3.bf16.msra.mxu0 %v1156_v51 }
  0x69   :  { %1086 = vmatprep.subr.bf16.mxu1 %v1278_v0  ;;  %1158 = vmatprep.subr.bf16.mxu0 %v1278_v0 }
  0x6b   :  { %896 = vmatmul.mubr.f32.vlgmr.msra.gmra.mrb[0].mxu1 %v1374_v30  ;;  %1001 = vmatmul.mubr.f32.vlgmr.msra.gmra.mrb[0].mxu0 %v1374_v30 }
  0x6c   :  { %1088 = vmatpush3.bf16.msra.mxu1 %v1087_v52  ;;  %1160 = vmatpush3.bf16.msra.mxu0 %v1339_v12  ;;  %v1096_v12 = vpack.c.bf16 %v1439_v58, %v1437_v57 }
  0x6d   :  { %1089 = vmatprep.subr.bf16.mxu1 %v1278_v0  ;;  %1161 = vmatprep.subr.bf16.mxu0 %v1278_v0 }
  0x6e   :  { %930 = vmatprep.mubr.msk.f32.mxu1 %vm1279_vm0, %v1280_v1  ;;  %1035 = vmatprep.mubr.msk.f32.mxu0 %vm1279_vm0, %v1280_v1  ;;  %v1099_v1 = vpack.c.bf16 %v1460_v6, %v1457_v5 }
  0x70   :  { %1091 = vmatpush3.bf16.msra.mxu1 %v1090_v54  ;;  %1163 = vmatpush3.bf16.msra.mxu0 %v1343_v13  ;;  %v1102_v13 = vpack.c.bf16 %v1478_v20, %v1473_v19 }
  0x71   :  { %1092 = vmatprep.subr.bf16.mxu1 %v1278_v0  ;;  %1164 = vmatprep.subr.bf16.mxu0 %v1278_v0 }
  0x74   :  { %1094 = vmatpush3.bf16.msra.mxu1 %v1093_v29  ;;  %1166 = vmatpush3.bf16.msra.mxu0 %v1349_v18  ;;  %v1105_v18 = vpack.c.bf16 %v1494_v34, %v1489_v28 }
  0x75   :  { %1095 = vmatprep.subr.bf16.mxu1 %v1278_v0  ;;  %1167 = vmatprep.subr.bf16.mxu0 %v1278_v0 }
  0x78   :  { %1097 = vmatpush3.bf16.msra.mxu1 %v1096_v12  ;;  %1169 = vmatpush3.bf16.msra.mxu0 %v1359_v23  ;;  %v1108_v23 = vpack.c.bf16 %v1514_v59, %v1509_v42 }
  0x79   :  { %1098 = vmatprep.subr.bf16.mxu1 %v1278_v0  ;;  %1170 = vmatprep.subr.bf16.mxu0 %v1278_v0 }
  0x7c   :  { %1100 = vmatpush3.bf16.msra.mxu1 %v1099_v1  ;;  %1172 = vmatpush3.bf16.msra.mxu0 %v1380_v32 }
  0x7d   :  { %1101 = vmatprep.subr.bf16.mxu1 %v1278_v0  ;;  %1173 = vmatprep.subr.bf16.mxu0 %v1278_v0 }
  0x80   :  { %1103 = vmatpush3.bf16.msra.mxu1 %v1102_v13  ;;  %1175 = vmatpush3.bf16.msra.mxu0 %v1405_v41 }
  0x81   :  { %1104 = vmatprep.subr.bf16.mxu1 %v1278_v0  ;;  %1176 = vmatprep.subr.bf16.mxu0 %v1278_v0 }
  0x84   :  { %1106 = vmatpush3.bf16.msra.mxu1 %v1105_v18  ;;  %1178 = vmatpush3.bf16.msra.mxu0 %v1430_v53 }
  0x85   :  { %1107 = vmatprep.subr.bf16.mxu1 %v1278_v0  ;;  %1179 = vmatprep.subr.bf16.mxu0 %v1278_v0 }
  0x88   :  { %1109 = vmatpush3.bf16.msra.mxu1 %v1108_v23  ;;  %1181 = vmatpush3.bf16.msra.mxu0 %v1451_v63 }
  0x8b   :  { %931 = vmatmul.mubr.f32.vlgmr.msra.gmra.mrb[0].mxu1 %v1397_v40  ;;  %1036 = vmatmul.mubr.f32.vlgmr.msra.gmra.mrb[0].mxu0 %v1374_v30 }
 0x15e   :  { %v407_v32 = vpop.f32.mrb[0].mxu1  ;;  %v702_v37 = vpop.f32.mrb[0].mxu0 }
 0x15f   :  { %v1182_v38 = vadd.f32 %v725_v31, %v407_v32  ;;  %v932_v41 = vpop.f32.mrb[1].mxu1  ;;  %v1037_v47 = vpop.f32.mrb[1].mxu0 }
 0x161   :  { %v1183_v48 = vadd.f32 %v1182_v38, %v702_v37 }
 0x163   :  { %1200 = vtanh.f32 %v1183_v48 }
 0x16d   :  { %v1201_v0 = vpop.eup %1200 }
 0x16e   :  { %v707_v53 = vadd.f32 %v1201_v0, %v1363_v26 }
 0x170   :  { %708 = vst [vmem:[#allocation7] sm:$0xff] %v707_v53 }
 0x171   :  { %1257 = shalt.err (!%p1254_p6)
}
 0x172   :  { %s1258_s15 = scalar_lea.hbm %s1603_s3, 128 }
 0x173   :  { %p1259_p7 = scmp.ne.s32.totalorder %s1603_s3, %s1258_s15  ;;  %p1262_p8 = scmp.lt.u32.totalorder %s1258_s15, %s1603_s3 }
 0x175   :  { %p1264_p9 = pnand %p1262_p8, %p1259_p7 }
 0x177   :  { %1267 = shalt.err (!%p1264_p9)
}
 0x178   :  { %718 = dma.vmem_to_hbm [thread:$0]  %s716_s12, 128, %s1603_s3, [#allocation4]  }
 0x179   :  { %1272 = dma.done.wait [#allocation4], 128  }
 0x17a   :  { %1273 = vsyncadd [#allocation4], 4294967168 }
 0x17b   :  { %722 = vsyncpa [#allocation3], 1 }
 0x17c   :  { %723 = vsyncpa [#allocation6], 1 }
 0x17d   :  { %724 = vsyncpa [#allocation4], 1 }

// kernel: tpu_custom_call.1
= control target key start
LH: loop header
LB: loop body
LE: loop exit
PB: predicated region body
PF: predicated region fallthrough
CT: control target
= control target key end

     0   :  { %8 = vsyncpa [#allocation3], 0  ;;  %s1600_s0 = inlined_call_operand.hbm [shape: f32[8,128], index: 0, kind: input, shape index: {}]   ;;  %s1601_s1 = inlined_call_operand.hbm [shape: f32[128,128], index: 1, kind: input, shape index: {}]   ;;  %s1602_s2 = inlined_call_operand.vmem [shape: f32[1,128], index: 2, kind: input, shape index: {}]   ;;  %s1603_s3 = inlined_call_operand.hbm [shape: f32[8,128], index: 3, kind: output, shape index: {}]  }
   0x1   :  { %9 = vsyncpa [#allocation6], 0 }
   0x2   :  { %10 = vsyncpa [#allocation4], 0  ;;  %s1274_s12 = smov [#allocation2]   ;;  %s1275_s14 = smov [#allocation5]  }
   0x3   :  { %s17_s13 = sshll.u32 %s1274_s12, 4  ;;  %s26_s15 = sshll.u32 %s1275_s14, 4  ;;  %s18_s13 = int_to_ptr.vmem [resolvable:$true] %s17_s13  ;;  %s1302_s15 = int_to_ptr.vmem [resolvable:$true] %s26_s15 }
   0x4   :  { %s1202_s18 = scalar_lea.hbm %s1600_s0, 128 }
   0x5   :  { %p1203_p0 = scmp.ne.s32.totalorder %s1600_s0, %s1202_s18  ;;  %p1206_p1 = scmp.lt.u32.totalorder %s1202_s18, %s1600_s0 }
   0x7   :  { %p1208_p2 = pnand %p1206_p1, %p1203_p0 }
   0x9   :  { %1211 = shalt.err (!%p1208_p2)
}
   0xa   :  { %s1212_s23 = scalar_lea.vmem %s18_s13, 128  ;;  %p1217_p4 = scmp.lt.s32.totalorder %s18_s13, %s18_s13 }
   0xb   :  { %p1213_p3 = scmp.ne.s32.totalorder %s18_s13, %s1212_s23  ;;  %p1218_p5 = scmp.lt.s32.totalorder %s1212_s23, %s1212_s23 }
   0xd   :  { %p1219_p6 = por %p1218_p5, %p1217_p4 }
   0xf   :  { %p1220_p7 = pnand %p1219_p6, %p1213_p3 }
  0x11   :  { %1223 = shalt.err (!%p1220_p7)
}
  0x12   :  { %20 = dma.hbm_to_vmem [thread:$0]  %s1600_s0, 128, %s18_s13, [#allocation3]  }
  0x13   :  { %s1224_s28 = scalar_lea.hbm %s1601_s1, 2048 }
  0x14   :  { %p1225_p8 = scmp.ne.s32.totalorder %s1601_s1, %s1224_s28  ;;  %p1228_p9 = scmp.lt.u32.totalorder %s1224_s28, %s1601_s1 }
  0x16   :  { %p1230_p10 = pnand %p1228_p9, %p1225_p8 }
  0x18   :  { %1233 = shalt.err (!%p1230_p10)
}
  0x19   :  { %s1234_s6 = scalar_lea.vmem %s1302_s15, 2048  ;;  %p1239_p12 = scmp.lt.s32.totalorder %s1302_s15, %s1302_s15 }
  0x1a   :  { %p1235_p11 = scmp.ne.s32.totalorder %s1302_s15, %s1234_s6  ;;  %p1240_p13 = scmp.lt.s32.totalorder %s1234_s6, %s1234_s6 }
  0x1c   :  { %p1241_p0 = por %p1240_p13, %p1239_p12 }
  0x1e   :  { %p1242_p1 = pnand %p1241_p0, %p1235_p11 }
  0x20   :  { %1245 = shalt.err (!%p1242_p1)
}
  0x21   :  { %s1276_s0 = smov 128   ;;  %s1277_s7 = smov 8  }
  0x22   :  { %32 = dma.hbm_to_vmem [thread:$0]  %s1601_s1, 2048, %s1302_s15, [#allocation6], %s1276_s0, %s1276_s0, %s1277_s7  }
  0x23   :  { %1268 = dma.done.wait [#allocation3], 128  }
  0x24   :  { %1269 = vsyncadd [#allocation3], 4294967168 }
  0x25   :  { %1270 = dma.done.wait [#allocation6], 2048  }
  0x26   :  { %1271 = vsyncadd [#allocation6], 4294965248  ;;  %v1278_v0 = vmov 0.0|0.0   ;;  %vm1279_vm0 = vmmov 0   ;;  %v1280_v1 = vmov 0.0   ;;  %v42_v2 = vld [vmem:[#allocation5] sm:$0xff] }
  0x27   :  { %1038 = vmatprep.subr.bf16.mxu1 %v1278_v0  ;;  %1110 = vmatprep.subr.bf16.mxu0 %v1278_v0  ;;  %v43_v3 = vld [vmem:[#allocation5 + $0x8] sm:$0xff]  ;;  %v44_v4 = vld [vmem:[#allocation5 + $0x10] sm:$0xff]  ;;  %v66_v5 = vand.u32 4294901760, %v42_v2  ;;  %v45_v7 = vld [vmem:[#allocation5 + $0x18] sm:$0xff]  ;;  %s1281_s11 = smov [#allocation7]  }
  0x28   :  { %860 = vmatprep.mubr.msk.f32.mxu1 %vm1279_vm0, %v1280_v1  ;;  %965 = vmatprep.mubr.msk.f32.mxu0 %vm1279_vm0, %v1280_v1  ;;  %v69_v6 = vand.u32 4294901760, %v43_v3  ;;  %v72_v8 = vand.u32 4294901760, %v44_v4  ;;  %v75_v9 = vand.u32 4294901760, %v45_v7  ;;  %v46_v10 = vld [vmem:[#allocation5 + $0x20] sm:$0xff]  ;;  %v47_v11 = vld [vmem:[#allocation5 + $0x28] sm:$0xff]  ;;  %v48_v16 = vld [vmem:[#allocation5 + $0x30] sm:$0xff] }
  0x29   :  { %v78_v14 = vand.u32 4294901760, %v46_v10  ;;  %v81_v15 = vand.u32 4294901760, %v47_v11  ;;  %v49_v17 = vld [vmem:[#allocation5 + $0x38] sm:$0xff]  ;;  %v84_v19 = vand.u32 4294901760, %v48_v16  ;;  %v1353_v21 = vld [vmem:[#allocation5 + $0x40] sm:$0xff]  ;;  %v1355_v22 = vld [vmem:[#allocation5 + $0x48] sm:$0xff]  ;;  %v1371_v29 = vsub.f32 %v42_v2, %v66_v5 }
  0x2a   :  { %v1339_v12 = vpack.c.bf16 %v69_v6, %v66_v5  ;;  %v1343_v13 = vpack.c.bf16 %v75_v9, %v72_v8  ;;  %v87_v20 = vand.u32 4294901760, %v49_v17  ;;  %v90_v24 = vand.u32 4294901760, %v1353_v21  ;;  %v1363_v26 = vld [vmem:[#allocation2] sm:$0xff]  ;;  %v1367_v27 = vld [vmem:[#allocation5 + $0x50] sm:$0xff]  ;;  %v1384_v35 = vld [vmem:[#allocation5 + $0x60] sm:$0xff]  ;;  %s715_s12 = sshll.u32 %s1281_s11, 4  ;;  %s716_s12 = int_to_ptr.vmem [resolvable:$true] %s715_s12 }
  0x2b   :  { %v1349_v18 = vpack.c.bf16 %v81_v15, %v78_v14  ;;  %v93_v25 = vand.u32 4294901760, %v1355_v22  ;;  %v1369_v28 = vld [vmem:[#allocation5 + $0x58] sm:$0xff]  ;;  %v1374_v30 = vand.u32 4294901760, %v1363_v26  ;;  %v1376_v31 = vsub.f32 %v43_v3, %v69_v6  ;;  %v1388_v36 = vld [vmem:[#allocation5 + $0x68] sm:$0xff]  ;;  %v1408_v43 = vld [vmem:[#allocation5 + $0x70] sm:$0xff]  ;;  %s1246_s13 = scalar_lea.vmem %s716_s12, 128  ;;  %p1251_p3 = scmp.lt.s32.totalorder %s716_s12, %s716_s12 }
  0x2c   :  { %1040 = vmatpush3.bf16.msra.mxu1 %v1339_v12  ;;  %1112 = vmatpush3.bf16.msra.mxu0 %v1339_v12  ;;  %v1359_v23 = vpack.c.bf16 %v87_v20, %v84_v19  ;;  %v96_v33 = vand.u32 4294901760, %v1367_v27  ;;  %v99_v34 = vand.u32 4294901760, %v1369_v28  ;;  %v1390_v37 = vsub.f32 %v44_v4, %v72_v8  ;;  %v1410_v44 = vld [vmem:[#allocation5 + $0x78] sm:$0xff]  ;;  %p1247_p2 = scmp.ne.s32.totalorder %s716_s12, %s1246_s13  ;;  %p1252_p4 = scmp.lt.s32.totalorder %s1246_s13, %s1246_s13 }
  0x2d   :  { %1041 = vmatprep.subr.bf16.mxu1 %v1278_v0  ;;  %1113 = vmatprep.subr.bf16.mxu0 %v1278_v0  ;;  %v1380_v32 = vpack.c.bf16 %v93_v25, %v90_v24  ;;  %v1392_v38 = vsub.f32 %v45_v7, %v75_v9  ;;  %v102_v39 = vand.u32 4294901760, %v1384_v35  ;;  %v1397_v40 = vsub.f32 %v1363_v26, %v1374_v30 }
  0x2e   :  { %v1405_v41 = vpack.c.bf16 %v99_v34, %v96_v33  ;;  %v105_v42 = vand.u32 4294901760, %v1388_v36  ;;  %v159_v45 = vand.u32 4294901760, %v1371_v29  ;;  %v166_v46 = vand.u32 4294901760, %v1376_v31  ;;  %p1253_p5 = por %p1252_p4, %p1251_p3 }
  0x2f   :  { %v1416_v47 = vsub.f32 %v46_v10, %v78_v14  ;;  %v1418_v48 = vsub.f32 %v47_v11, %v81_v15  ;;  %v108_v49 = vand.u32 4294901760, %v1408_v43  ;;  %v111_v50 = vand.u32 4294901760, %v1410_v44 }
  0x30   :  { %1043 = vmatpush3.bf16.msra.mxu1 %v1343_v13  ;;  %1115 = vmatpush3.bf16.msra.mxu0 %v1343_v13  ;;  %v148_v51 = vand.u32 4294901760, %v1397_v40  ;;  %v173_v52 = vand.u32 4294901760, %v1390_v37  ;;  %v1430_v53 = vpack.c.bf16 %v105_v42, %v102_v39  ;;  %v160_v54 = vsub.f32 %v1371_v29, %v159_v45  ;;  %p1254_p6 = pnand %p1253_p5, %p1247_p2 }
  0x31   :  { %1044 = vmatprep.subr.bf16.mxu1 %v1278_v0  ;;  %1116 = vmatprep.subr.bf16.mxu0 %v1278_v0  ;;  %v167_v55 = vsub.f32 %v1376_v31, %v166_v46  ;;  %v180_v56 = vand.u32 4294901760, %v1392_v38  ;;  %v1437_v57 = vsub.f32 %v48_v16, %v84_v19  ;;  %v1439_v58 = vsub.f32 %v49_v17, %v87_v20 }
  0x32   :  { %v149_v59 = vsub.f32 %v1397_v40, %v148_v51  ;;  %v174_v60 = vsub.f32 %v1390_v37, %v173_v52  ;;  %v187_v61 = vand.u32 4294901760, %v1416_v47  ;;  %v194_v62 = vand.u32 4294901760, %v1418_v48 }
  0x33   :  { %v1451_v63 = vpack.c.bf16 %v111_v50, %v108_v49  ;;  %v161_v2 = vand.u32 4294901760, %v160_v54  ;;  %v168_v3 = vand.u32 4294901760, %v167_v55  ;;  %v181_v4 = vsub.f32 %v1392_v38, %v180_v56 }
  0x34   :  { %1046 = vmatpush3.bf16.msra.mxu1 %v1349_v18  ;;  %1118 = vmatpush3.bf16.msra.mxu0 %v1349_v18  ;;  %v1457_v5 = vsub.f32 %v1353_v21, %v90_v24  ;;  %v1460_v6 = vsub.f32 %v1355_v22, %v93_v25  ;;  %v1135_v7 = vpack.c.bf16 %v166_v46, %v159_v45  ;;  %v150_v8 = vand.u32 4294901760, %v149_v59 }
  0x35   :  { %1047 = vmatprep.subr.bf16.mxu1 %v1278_v0  ;;  %1119 = vmatprep.subr.bf16.mxu0 %v1278_v0  ;;  %v175_v9 = vand.u32 4294901760, %v174_v60  ;;  %v188_v10 = vsub.f32 %v1416_v47, %v187_v61  ;;  %v195_v11 = vsub.f32 %v1418_v48, %v194_v62  ;;  %v1063_v14 = vpack.c.bf16 %v168_v3, %v161_v2 }
  0x36   :  { %v182_v15 = vand.u32 4294901760, %v181_v4  ;;  %v201_v16 = vand.u32 4294901760, %v1437_v57  ;;  %v208_v17 = vand.u32 4294901760, %v1439_v58  ;;  %v1473_v19 = vsub.f32 %v1367_v27, %v96_v33 }
  0x37   :  { %v1478_v20 = vsub.f32 %v1369_v28, %v99_v34  ;;  %v1138_v21 = vpack.c.bf16 %v180_v56, %v173_v52  ;;  %v189_v22 = vand.u32 4294901760, %v188_v10  ;;  %v196_v24 = vand.u32 4294901760, %v195_v11 }
  0x38   :  { %1049 = vmatpush3.bf16.msra.mxu1 %v1359_v23  ;;  %1121 = vmatpush3.bf16.msra.mxu0 %v1359_v23  ;;  %v215_v25 = vand.u32 4294901760, %v1457_v5  ;;  %v1066_v45 = vpack.c.bf16 %v182_v15, %v175_v9  ;;  %v202_v46 = vsub.f32 %v1437_v57, %v201_v16  ;;  %v209_v27 = vsub.f32 %v1439_v58, %v208_v17 }
  0x39   :  { %1050 = vmatprep.subr.bf16.mxu1 %v1278_v0  ;;  %1122 = vmatprep.subr.bf16.mxu0 %v1278_v0  ;;  %v222_v33 = vand.u32 4294901760, %v1460_v6  ;;  %v1489_v28 = vsub.f32 %v1384_v35, %v102_v39  ;;  %v1494_v34 = vsub.f32 %v1388_v36, %v105_v42  ;;  %v1141_v52 = vpack.c.bf16 %v194_v62, %v187_v61 }
  0x3a   :  { %v216_v54 = vsub.f32 %v1457_v5, %v215_v25  ;;  %v229_v55 = vand.u32 4294901760, %v1473_v19  ;;  %v203_v35 = vand.u32 4294901760, %v202_v46  ;;  %v210_v39 = vand.u32 4294901760, %v209_v27 }
  0x3b   :  { %v223_v56 = vsub.f32 %v1460_v6, %v222_v33  ;;  %v236_v36 = vand.u32 4294901760, %v1478_v20  ;;  %v1509_v42 = vsub.f32 %v1408_v43, %v108_v49  ;;  %v1514_v59 = vsub.f32 %v1410_v44, %v111_v50 }
  0x3c   :  { %1052 = vmatpush3.bf16.msra.mxu1 %v1380_v32  ;;  %1124 = vmatpush3.bf16.msra.mxu0 %v1380_v32  ;;  %v1144_v60 = vpack.c.bf16 %v208_v17, %v201_v16  ;;  %v217_v61 = vand.u32 4294901760, %v216_v54  ;;  %v230_v62 = vsub.f32 %v1473_v19, %v229_v55  ;;  %v243_v2 = vand.u32 4294901760, %v1489_v28 }
  0x3d   :  { %1053 = vmatprep.subr.bf16.mxu1 %v1278_v0  ;;  %1125 = vmatprep.subr.bf16.mxu0 %v1278_v0  ;;  %v1072_v3 = vpack.c.bf16 %v210_v39, %v203_v35  ;;  %v224_v4 = vand.u32 4294901760, %v223_v56  ;;  %v250_v43 = vand.u32 4294901760, %v1494_v34  ;;  %v1147_v44 = vpack.c.bf16 %v222_v33, %v215_v25 }
  0x3e   :  { %v231_v49 = vand.u32 4294901760, %v230_v62  ;;  %v244_v50 = vsub.f32 %v1489_v28, %v243_v2  ;;  %v1150_v15 = vpack.c.bf16 %v236_v36, %v229_v55  ;;  %v1090_v54 = vpack.c.bf16 %v1392_v38, %v1390_v37 }
  0x3f   :  { %v1075_v9 = vpack.c.bf16 %v224_v4, %v217_v61  ;;  %v251_v11 = vsub.f32 %v1494_v34, %v250_v43 }
  0x40   :  { %1055 = vmatpush3.bf16.msra.mxu1 %v1405_v41  ;;  %1127 = vmatpush3.bf16.msra.mxu0 %v1405_v41  ;;  %v245_v16 = vand.u32 4294901760, %v244_v50 }
  0x41   :  { %1056 = vmatprep.subr.bf16.mxu1 %v1278_v0  ;;  %1128 = vmatprep.subr.bf16.mxu0 %v1278_v0 }
  0x44   :  { %1058 = vmatpush3.bf16.msra.mxu1 %v1430_v53  ;;  %1130 = vmatpush3.bf16.msra.mxu0 %v1430_v53 }
  0x45   :  { %1059 = vmatprep.subr.bf16.mxu1 %v1278_v0  ;;  %1131 = vmatprep.subr.bf16.mxu0 %v1278_v0 }
  0x48   :  { %1061 = vmatpush3.bf16.msra.mxu1 %v1451_v63  ;;  %1133 = vmatpush3.bf16.msra.mxu0 %v1451_v63 }
  0x49   :  { %1062 = vmatprep.subr.bf16.mxu1 %v1278_v0  ;;  %1134 = vmatprep.subr.bf16.mxu0 %v1278_v0 }
  0x4b   :  { %861 = vmatmul.mubr.f32.vlgmr.msra.gmra.mrb[0].mxu1 %v150_v8  ;;  %966 = vmatmul.mubr.f32.vlgmr.msra.gmra.mrb[0].mxu0 %v148_v51  ;;  %v1069_v51 = vpack.c.bf16 %v196_v24, %v189_v22  ;;  %v257_v8 = vand.u32 4294901760, %v1509_v42 }
  0x4c   :  { %1064 = vmatpush3.bf16.msra.mxu1 %v1063_v14  ;;  %1136 = vmatpush3.bf16.msra.mxu0 %v1135_v7  ;;  %v237_v7 = vsub.f32 %v1478_v20, %v236_v36  ;;  %v264_v14 = vand.u32 4294901760, %v1514_v59 }
  0x4d   :  { %1065 = vmatprep.subr.bf16.mxu1 %v1278_v0  ;;  %1137 = vmatprep.subr.bf16.mxu0 %v1278_v0  ;;  %v258_v22 = vsub.f32 %v1509_v42, %v257_v8 }
  0x4e   :  { %895 = vmatprep.mubr.msk.f32.mxu1 %vm1279_vm0, %v1280_v1  ;;  %1000 = vmatprep.mubr.msk.f32.mxu0 %vm1279_vm0, %v1280_v1  ;;  %v238_v10 = vand.u32 4294901760, %v237_v7  ;;  %v265_v24 = vsub.f32 %v1514_v59, %v264_v14 }
  0x4f   :  { %v259_v46 = vand.u32 4294901760, %v258_v22 }
  0x50   :  { %1067 = vmatpush3.bf16.msra.mxu1 %v1066_v45  ;;  %1139 = vmatpush3.bf16.msra.mxu0 %v1138_v21  ;;  %v1078_v17 = vpack.c.bf16 %v238_v10, %v231_v49  ;;  %v252_v21 = vand.u32 4294901760, %v251_v11  ;;  %v1153_v45 = vpack.c.bf16 %v250_v43, %v243_v2  ;;  %v266_v27 = vand.u32 4294901760, %v265_v24 }
  0x51   :  { %1068 = vmatprep.subr.bf16.mxu1 %v1278_v0  ;;  %1140 = vmatprep.subr.bf16.mxu0 %v1278_v0 }
  0x52   :  { %v1081_v25 = vpack.c.bf16 %v252_v21, %v245_v16  ;;  %v1084_v33 = vpack.c.bf16 %v266_v27, %v259_v46 }
  0x54   :  { %1070 = vmatpush3.bf16.msra.mxu1 %v1069_v51  ;;  %1142 = vmatpush3.bf16.msra.mxu0 %v1141_v52  ;;  %v1156_v51 = vpack.c.bf16 %v264_v14, %v257_v8  ;;  %v1087_v52 = vpack.c.bf16 %v1376_v31, %v1371_v29  ;;  %v1093_v29 = vpack.c.bf16 %v1418_v48, %v1416_v47  ;;  %v725_v31 = vld [vmem:[%s1602_s2] ss:$0 sm:$0xff] }
  0x55   :  { %1071 = vmatprep.subr.bf16.mxu1 %v1278_v0  ;;  %1143 = vmatprep.subr.bf16.mxu0 %v1278_v0 }
  0x58   :  { %1073 = vmatpush3.bf16.msra.mxu1 %v1072_v3  ;;  %1145 = vmatpush3.bf16.msra.mxu0 %v1144_v60 }
  0x59   :  { %1074 = vmatprep.subr.bf16.mxu1 %v1278_v0  ;;  %1146 = vmatprep.subr.bf16.mxu0 %v1278_v0 }
  0x5c   :  { %1076 = vmatpush3.bf16.msra.mxu1 %v1075_v9  ;;  %1148 = vmatpush3.bf16.msra.mxu0 %v1147_v44 }
  0x5d   :  { %1077 = vmatprep.subr.bf16.mxu1 %v1278_v0  ;;  %1149 = vmatprep.subr.bf16.mxu0 %v1278_v0 }
  0x60   :  { %1079 = vmatpush3.bf16.msra.mxu1 %v1078_v17  ;;  %1151 = vmatpush3.bf16.msra.mxu0 %v1150_v15 }
  0x61   :  { %1080 = vmatprep.subr.bf16.mxu1 %v1278_v0  ;;  %1152 = vmatprep.subr.bf16.mxu0 %v1278_v0 }
  0x64   :  { %1082 = vmatpush3.bf16.msra.mxu1 %v1081_v25  ;;  %1154 = vmatpush3.bf16.msra.mxu0 %v1153_v45 }
  0x65   :  { %1083 = vmatprep.subr.bf16.mxu1 %v1278_v0  ;;  %1155 = vmatprep.subr.bf16.mxu0 %v1278_v0 }
  0x68   :  { %1085 = vmatpush3.bf16.msra.mxu1 %v1084_v33  ;;  %1157 = vmatpush3.bf16.msra.mxu0 %v1156_v51 }
  0x69   :  { %1086 = vmatprep.subr.bf16.mxu1 %v1278_v0  ;;  %1158 = vmatprep.subr.bf16.mxu0 %v1278_v0 }
  0x6b   :  { %896 = vmatmul.mubr.f32.vlgmr.msra.gmra.mrb[0].mxu1 %v1374_v30  ;;  %1001 = vmatmul.mubr.f32.vlgmr.msra.gmra.mrb[0].mxu0 %v1374_v30 }
  0x6c   :  { %1088 = vmatpush3.bf16.msra.mxu1 %v1087_v52  ;;  %1160 = vmatpush3.bf16.msra.mxu0 %v1339_v12  ;;  %v1096_v12 = vpack.c.bf16 %v1439_v58, %v1437_v57 }
  0x6d   :  { %1089 = vmatprep.subr.bf16.mxu1 %v1278_v0  ;;  %1161 = vmatprep.subr.bf16.mxu0 %v1278_v0 }
  0x6e   :  { %930 = vmatprep.mubr.msk.f32.mxu1 %vm1279_vm0, %v1280_v1  ;;  %1035 = vmatprep.mubr.msk.f32.mxu0 %vm1279_vm0, %v1280_v1  ;;  %v1099_v1 = vpack.c.bf16 %v1460_v6, %v1457_v5 }
  0x70   :  { %1091 = vmatpush3.bf16.msra.mxu1 %v1090_v54  ;;  %1163 = vmatpush3.bf16.msra.mxu0 %v1343_v13  ;;  %v1102_v13 = vpack.c.bf16 %v1478_v20, %v1473_v19 }
  0x71   :  { %1092 = vmatprep.subr.bf16.mxu1 %v1278_v0  ;;  %1164 = vmatprep.subr.bf16.mxu0 %v1278_v0 }
  0x74   :  { %1094 = vmatpush3.bf16.msra.mxu1 %v1093_v29  ;;  %1166 = vmatpush3.bf16.msra.mxu0 %v1349_v18  ;;  %v1105_v18 = vpack.c.bf16 %v1494_v34, %v1489_v28 }
  0x75   :  { %1095 = vmatprep.subr.bf16.mxu1 %v1278_v0  ;;  %1167 = vmatprep.subr.bf16.mxu0 %v1278_v0 }
  0x78   :  { %1097 = vmatpush3.bf16.msra.mxu1 %v1096_v12  ;;  %1169 = vmatpush3.bf16.msra.mxu0 %v1359_v23  ;;  %v1108_v23 = vpack.c.bf16 %v1514_v59, %v1509_v42 }
  0x79   :  { %1098 = vmatprep.subr.bf16.mxu1 %v1278_v0  ;;  %1170 = vmatprep.subr.bf16.mxu0 %v1278_v0 }
  0x7c   :  { %1100 = vmatpush3.bf16.msra.mxu1 %v1099_v1  ;;  %1172 = vmatpush3.bf16.msra.mxu0 %v1380_v32 }
  0x7d   :  { %1101 = vmatprep.subr.bf16.mxu1 %v1278_v0  ;;  %1173 = vmatprep.subr.bf16.mxu0 %v1278_v0 }
  0x80   :  { %1103 = vmatpush3.bf16.msra.mxu1 %v1102_v13  ;;  %1175 = vmatpush3.bf16.msra.mxu0 %v1405_v41 }
  0x81   :  { %1104 = vmatprep.subr.bf16.mxu1 %v1278_v0  ;;  %1176 = vmatprep.subr.bf16.mxu0 %v1278_v0 }
  0x84   :  { %1106 = vmatpush3.bf16.msra.mxu1 %v1105_v18  ;;  %1178 = vmatpush3.bf16.msra.mxu0 %v1430_v53 }
  0x85   :  { %1107 = vmatprep.subr.bf16.mxu1 %v1278_v0  ;;  %1179 = vmatprep.subr.bf16.mxu0 %v1278_v0 }
  0x88   :  { %1109 = vmatpush3.bf16.msra.mxu1 %v1108_v23  ;;  %1181 = vmatpush3.bf16.msra.mxu0 %v1451_v63 }
  0x8b   :  { %931 = vmatmul.mubr.f32.vlgmr.msra.gmra.mrb[0].mxu1 %v1397_v40  ;;  %1036 = vmatmul.mubr.f32.vlgmr.msra.gmra.mrb[0].mxu0 %v1374_v30 }
 0x15e   :  { %v407_v32 = vpop.f32.mrb[0].mxu1  ;;  %v702_v37 = vpop.f32.mrb[0].mxu0 }
 0x15f   :  { %v1182_v38 = vadd.f32 %v725_v31, %v407_v32  ;;  %v932_v41 = vpop.f32.mrb[1].mxu1  ;;  %v1037_v47 = vpop.f32.mrb[1].mxu0 }
 0x161   :  { %v1183_v48 = vadd.f32 %v1182_v38, %v702_v37 }
 0x163   :  { %1200 = vtanh.f32 %v1183_v48 }
 0x16d   :  { %v1201_v0 = vpop.eup %1200 }
 0x16e   :  { %v707_v53 = vadd.f32 %v1201_v0, %v1363_v26 }
 0x170   :  { %708 = vst [vmem:[#allocation7] sm:$0xff] %v707_v53 }
 0x171   :  { %1257 = shalt.err (!%p1254_p6)
}
 0x172   :  { %s1258_s15 = scalar_lea.hbm %s1603_s3, 128 }
 0x173   :  { %p1259_p7 = scmp.ne.s32.totalorder %s1603_s3, %s1258_s15  ;;  %p1262_p8 = scmp.lt.u32.totalorder %s1258_s15, %s1603_s3 }
 0x175   :  { %p1264_p9 = pnand %p1262_p8, %p1259_p7 }
 0x177   :  { %1267 = shalt.err (!%p1264_p9)
}
 0x178   :  { %718 = dma.vmem_to_hbm [thread:$0]  %s716_s12, 128, %s1603_s3, [#allocation4]  }
 0x179   :  { %1272 = dma.done.wait [#allocation4], 128  }
 0x17a   :  { %1273 = vsyncadd [#allocation4], 4294967168 }
 0x17b   :  { %722 = vsyncpa [#allocation3], 1 }
 0x17c   :  { %723 = vsyncpa [#allocation6], 1 }
 0x17d   :  { %724 = vsyncpa [#allocation4], 1 }

</bundles_post_ra>
